<compile_context>
chip_gen: v7x
topology: tpu7x:2x2x1
jax: 0.10.0
libtpu: 0.0.40
codegen_flags: <defaults>
</compile_context>

<pallas_src>
import functools
import math

import jax
import jax.numpy as jnp
from jax import lax
from jax.experimental import pallas as pl
from jax.experimental.pallas import tpu as pltpu

LANES = 128
MAX_BLOCK_ROWS = 4096   # (4096,128) f32 = 2 MiB/input; 2 inputs double-buffered = 8 MiB VMEM
SLAB_ROWS = 64          # inner-loop slab: 8 f32 vregs per input -> stays in registers


def _partial_sums_kernel(x_ref, y_ref, o_ref, acc_ref, *,
                         block_rows, acc_rows, slab_rows, steps_per_split,
                         valid_rows, first_masked_step, total_grid_steps,
                         unroll):
    s = pl.program_id(0)
    j = pl.program_id(1)
    g = s * steps_per_split + j          # global (unclamped) step index

    @pl.when(j == 0)
    def _init():
        acc_ref[...] = jnp.zeros_like(acc_ref)

    num_slabs = block_rows // slab_rows

    def red(v):
        # Reduce a (slab_rows, 128) slab to (acc_rows, 128); stays on the VPU.
        return jnp.sum(v.reshape(-1, acc_rows, LANES), axis=0)

    def accumulate(masked):
        def slab_body(i, carry):
            sx, sy, sxy, sxx, syy, sdd = carry
            r0 = pl.multiple_of(i * slab_rows, slab_rows)
            xs = x_ref[pl.ds(r0, slab_rows), :].astype(jnp.float32)
            ys = y_ref[pl.ds(r0, slab_rows), :].astype(jnp.float32)
            if masked:
                # Rows at/after valid_rows are either garbage (partial last
                # block: Pallas does not zero-fill the pad region) or
                # duplicated data (ghost steps of the 2-way split): zero them.
                row0 = g * block_rows + r0
                local = lax.broadcasted_iota(jnp.int32, xs.shape, 0)
                keep = (row0 + local) < valid_rows
                fzero = jnp.float32(0.0)
                xs = jnp.where(keep, xs, fzero)
                ys = jnp.where(keep, ys, fzero)
            d = xs - ys
            return (sx + red(xs), sy + red(ys), sxy + red(xs * ys),
                    sxx + red(xs * xs), syy + red(ys * ys), sdd + red(d * d))

        zeros0 = jnp.zeros((acc_rows, LANES), jnp.float32)
        sums = lax.fori_loop(0, num_slabs, slab_body, (zeros0,) * 6,
                             unroll=unroll)
        for idx in range(6):
            acc_ref[idx] += sums[idx]

    if first_masked_step >= total_grid_steps:
        # No partial tail block and no ghost steps: single fast path.
        accumulate(masked=False)
    else:
        # Mask cost only paid on the final partial block / ghost steps.
        @pl.when(g < first_masked_step)
        def _full():
            accumulate(masked=False)

        @pl.when(g >= first_masked_step)
        def _tail():
            accumulate(masked=True)

    @pl.when(j == pl.num_programs(1) - 1)
    def _finalize():
        o_ref[0] = acc_ref[...]


def pearson_mse_loss(x, target, *, max_block_rows=MAX_BLOCK_ROWS):
    """Equivalent of PearsonMSE_loss.forward(x, target) -> scalar f32."""
    assert x.shape == target.shape
    n = x.size
    xf = x.reshape(-1)
    yf = target.reshape(-1)

    padded = pl.cdiv(n, LANES) * LANES
    if padded != n:
        # Pad only the (<128-element) tail; zeros do not perturb the sums
        # because the true n is used for all means.
        xf = jnp.pad(xf, (0, padded - n))
        yf = jnp.pad(yf, (0, padded - n))

    rows = padded // LANES
    x2 = xf.reshape(rows, LANES)   # free, layout-compatible reshape
    y2 = yf.reshape(rows, LANES)

    block_rows = rows if rows <= max_block_rows else max_block_rows
    total_steps = pl.cdiv(rows, block_rows)

    acc_rows = math.gcd(block_rows, 8)        # <= 8, divides block_rows
    slab_rows = math.gcd(block_rows, SLAB_ROWS)
    num_slabs = block_rows // slab_rows
    unroll = max(1, min(8, num_slabs))

    # Always engage the 2-way "parallel" split when there is more than one
    # block (v7x: each TensorCore streams half; on 1-TC chips it is just a
    # loop split).  Odd step counts get one extra "ghost" step whose block
    # index is clamped and whose contribution is masked to zero.
    n_splits = 2 if total_steps >= 2 else 1
    steps_per_split = pl.cdiv(total_steps, n_splits)
    total_grid_steps = n_splits * steps_per_split

    has_tail = (rows % block_rows) != 0
    first_masked_step = total_steps - 1 if has_tail else total_steps

    if total_grid_steps > total_steps:
        def in_map(si, ji):
            # Clamp ghost steps onto the last real block (its contribution is
            # masked to zero in-kernel), keeping the DMA in range.
            return (jnp.minimum(si * steps_per_split + ji, total_steps - 1), 0)
    else:
        def in_map(si, ji):
            return (si * steps_per_split + ji, 0)
    in_spec = pl.BlockSpec((block_rows, LANES), in_map)

    kernel = functools.partial(
        _partial_sums_kernel,
        block_rows=block_rows, acc_rows=acc_rows, slab_rows=slab_rows,
        steps_per_split=steps_per_split, valid_rows=rows,
        first_masked_step=first_masked_step,
        total_grid_steps=total_grid_steps, unroll=unroll)

    itemsize = jnp.dtype(x.dtype).itemsize
    out_bytes = n_splits * 6 * acc_rows * LANES * 4
    cost = pl.CostEstimate(
        flops=12 * n,
        transcendentals=0,
        bytes_accessed=2 * n * itemsize + out_bytes)

    # 2 inputs x 2 pipeline buffers per block, plus generous headroom; >= the
    # smallest per-chip scoped-VMEM default so larger blocks never trip it.
    vmem_limit_bytes = max(2 * 2 * block_rows * LANES * itemsize + (4 << 20),
                           16 << 20)

    partials = pl.pallas_call(
        kernel,
        out_shape=jax.ShapeDtypeStruct((n_splits, 6, acc_rows, LANES),
                                       jnp.float32),
        grid_spec=pltpu.PrefetchScalarGridSpec(
            num_scalar_prefetch=0,
            grid=(n_splits, steps_per_split),
            in_specs=[in_spec, in_spec],
            out_specs=pl.BlockSpec((1, 6, acc_rows, LANES),
                                   lambda si, ji: (si, 0, 0, 0)),
            scratch_shapes=[pltpu.VMEM((6, acc_rows, LANES), jnp.float32)],
        ),
        compiler_params=pltpu.CompilerParams(
            dimension_semantics=("parallel", "arbitrary"),
            vmem_limit_bytes=vmem_limit_bytes),
        cost_estimate=cost,
    )(x2, y2)

    # Tiny finalize in plain JAX: combine per-split partials and compute loss.
    sums = partials.sum(axis=(0, 2, 3))            # 6 scalar sums
    sum_x, sum_y, sum_xy = sums[0], sums[1], sums[2]
    sum_xx, sum_yy, sum_sq = sums[3], sums[4], sums[5]

    n_f = jnp.float32(n)
    mean_x = sum_x / n_f
    mean_y = sum_y / n_f
    sxy = sum_xy - n_f * mean_x * mean_y            # sum(vx*vy)
    sxx = sum_xx - n_f * mean_x * mean_x            # sum(vx^2)
    syy = sum_yy - n_f * mean_y * mean_y            # sum(vy^2)

    cost_p = sxy / (jnp.sqrt(sxx) * jnp.sqrt(syy) + jnp.float32(1e-4))
    pearson_loss = jnp.float32(1.0) - cost_p
    mse = sum_sq / n_f
    return mse + pearson_loss


def _reference(x, target):
    x = x.astype(jnp.float32)
    y = target.astype(jnp.float32)
    mse = jnp.mean((x - y) ** 2)
    vx = x - jnp.mean(x)
    vy = y - jnp.mean(y)
    cost = jnp.sum(vx * vy) / (
        jnp.sqrt(jnp.sum(vx ** 2)) * jnp.sqrt(jnp.sum(vy ** 2)) + 0.0001)
    return mse + (1.0 - cost)


if __name__ == "__main__":
    key = jax.random.PRNGKey(0)
    kx, ky = jax.random.split(key)

    # Small NCHW shape (single block, single split).
    x = jax.random.normal(kx, (2, 4, 16, 16), dtype=jnp.float32)
    y = jax.random.normal(ky, (2, 4, 16, 16), dtype=jnp.float32) * 0.5 + 0.3 * x
    loss = pearson_mse_loss(x, y)
    jax.block_until_ready(loss)
    ref = _reference(x, y)
    assert jnp.allclose(loss, ref, rtol=1e-4, atol=1e-4), (loss, ref)

    # Tiny shape whose element count is not a multiple of 128 (tail pad path,
    # acc_rows < 8).
    xt = jax.random.normal(kx, (2, 3, 11, 13), dtype=jnp.float32)
    yt = jax.random.normal(ky, (2, 3, 11, 13), dtype=jnp.float32) * 0.7 + 0.2 * xt
    loss_t = pearson_mse_loss(xt, yt)
    jax.block_until_ready(loss_t)
    ref_t = _reference(xt, yt)
    assert jnp.allclose(loss_t, ref_t, rtol=1e-4, atol=1e-4), (loss_t, ref_t)

    # Larger shape exercising multi-block streaming, the always-on 2-way
    # "parallel" split with an odd block count (ghost step) and the masked
    # partial tail block.
    xb = jax.random.normal(kx, (3, 8, 224, 224), dtype=jnp.float32)
    yb = jax.random.normal(ky, (3, 8, 224, 224), dtype=jnp.float32) * 0.5 + 0.3 * xb
    loss_b = pearson_mse_loss(xb, yb)
    jax.block_until_ready(loss_b)
    ref_b = _reference(xb, yb)
    assert jnp.allclose(loss_b, ref_b, rtol=5e-4, atol=5e-4), (loss_b, ref_b)

    print("KERNEL_OK")
</pallas_src>

<mosaic_0001>
module attributes {stable_mosaic.version = 11 : i64} {
  func.func @_partial_sums_kernel(%arg0: i32, %arg1: i32, %arg2: memref<16x128xf32, #tpu.memory_space<vmem>>, %arg3: memref<16x128xf32, #tpu.memory_space<vmem>>, %arg4: memref<1x6x8x128xf32, #tpu.memory_space<vmem>>, %arg5: memref<6x8x128xf32, #tpu.memory_space<vmem>>) attributes {dimension_semantics = [#tpu.dimension_semantics<parallel>, #tpu.dimension_semantics<arbitrary>], iteration_bounds = array<i64: 1, 1>, scalar_prefetch = 0 : i64, scratch_operands = 1 : i64, tpu.core_type = #tpu.core_type<tc>, window_params = [{transform_indices = @transform_0, window_bounds = array<i64: 16, 128>}, {transform_indices = @transform_1, window_bounds = array<i64: 16, 128>}, {transform_indices = @transform_2, window_bounds = array<i64: 1, 6, 8, 128>}]} {
    %c0_i32 = arith.constant 0 : i32
    %0 = arith.cmpi eq, %arg1, %c0_i32 : i32
    %1 = arith.extui %0 : i1 to i32
    %c0_i32_0 = arith.constant 0 : i32
    %2 = arith.cmpi ne, %1, %c0_i32_0 : i32
    scf.if %2 {
      %cst_42 = arith.constant 0.000000e+00 : f32
      %72 = vector.broadcast %cst_42 : f32 to vector<6x8x128xf32>
      %c0_43 = arith.constant 0 : index
      %c0_44 = arith.constant 0 : index
      %c0_45 = arith.constant 0 : index
      %73 = vector.load %arg5[%c0_43, %c0_44, %c0_45] : memref<6x8x128xf32, #tpu.memory_space<vmem>>, vector<6x8x128xf32>
      tpu.vector_store %arg5[%c0_43, %c0_44, %c0_45], %72 {strides = array<i32>} : memref<6x8x128xf32, #tpu.memory_space<vmem>>, vector<6x8x128xf32>,
    } else {
    }
    %cst = arith.constant 0.000000e+00 : f32
    %3 = vector.broadcast %cst : f32 to vector<8x128xf32>
    %c0_i32_1 = arith.constant 0 : i32
    %c16_i32 = arith.constant 16 : i32
    %4 = arith.muli %c0_i32_1, %c16_i32 : i32
    %5 = tpu.assume_multiple %4, 16 : i32
    %6 = arith.index_cast %5 : i32 to index
    %c0 = arith.constant 0 : index
    %7 = vector.load %arg2[%6, %c0] : memref<16x128xf32, #tpu.memory_space<vmem>>, vector<16x128xf32>
    %8 = arith.index_cast %5 : i32 to index
    %c0_2 = arith.constant 0 : index
    %9 = vector.load %arg3[%8, %c0_2] : memref<16x128xf32, #tpu.memory_space<vmem>>, vector<16x128xf32>
    %10 = arith.subf %7, %9 : vector<16x128xf32>
    %11 = vector.shape_cast %7 : vector<16x128xf32> to vector<2x8x128xf32>
    %cst_3 = arith.constant dense<0.000000e+00> : vector<8x128xf32>
    %12 = vector.multi_reduction <add>, %11, %cst_3 [0] : vector<2x8x128xf32> to vector<8x128xf32>
    %13 = arith.addf %3, %12 : vector<8x128xf32>
    %14 = vector.shape_cast %9 : vector<16x128xf32> to vector<2x8x128xf32>
    %cst_4 = arith.constant dense<0.000000e+00> : vector<8x128xf32>
    %15 = vector.multi_reduction <add>, %14, %cst_4 [0] : vector<2x8x128xf32> to vector<8x128xf32>
    %16 = arith.addf %3, %15 : vector<8x128xf32>
    %17 = arith.mulf %7, %9 : vector<16x128xf32>
    %18 = vector.shape_cast %17 : vector<16x128xf32> to vector<2x8x128xf32>
    %cst_5 = arith.constant dense<0.000000e+00> : vector<8x128xf32>
    %19 = vector.multi_reduction <add>, %18, %cst_5 [0] : vector<2x8x128xf32> to vector<8x128xf32>
    %20 = arith.addf %3, %19 : vector<8x128xf32>
    %21 = arith.mulf %7, %7 : vector<16x128xf32>
    %22 = vector.shape_cast %21 : vector<16x128xf32> to vector<2x8x128xf32>
    %cst_6 = arith.constant dense<0.000000e+00> : vector<8x128xf32>
    %23 = vector.multi_reduction <add>, %22, %cst_6 [0] : vector<2x8x128xf32> to vector<8x128xf32>
    %24 = arith.addf %3, %23 : vector<8x128xf32>
    %25 = arith.mulf %9, %9 : vector<16x128xf32>
    %26 = vector.shape_cast %25 : vector<16x128xf32> to vector<2x8x128xf32>
    %cst_7 = arith.constant dense<0.000000e+00> : vector<8x128xf32>
    %27 = vector.multi_reduction <add>, %26, %cst_7 [0] : vector<2x8x128xf32> to vector<8x128xf32>
    %28 = arith.addf %3, %27 : vector<8x128xf32>
    %29 = arith.mulf %10, %10 : vector<16x128xf32>
    %30 = vector.shape_cast %29 : vector<16x128xf32> to vector<2x8x128xf32>
    %cst_8 = arith.constant dense<0.000000e+00> : vector<8x128xf32>
    %31 = vector.multi_reduction <add>, %30, %cst_8 [0] : vector<2x8x128xf32> to vector<8x128xf32>
    %32 = arith.addf %3, %31 : vector<8x128xf32>
    %c1_i32 = arith.constant 1 : i32
    %c0_9 = arith.constant 0 : index
    %c0_10 = arith.constant 0 : index
    %c0_11 = arith.constant 0 : index
    %33 = vector.load %arg5[%c0_9, %c0_10, %c0_11] : memref<6x8x128xf32, #tpu.memory_space<vmem>>, vector<1x8x128xf32>
    %34 = vector.shape_cast %33 : vector<1x8x128xf32> to vector<8x128xf32>
    %35 = arith.addf %34, %13 : vector<8x128xf32>
    %c0_12 = arith.constant 0 : index
    %c0_13 = arith.constant 0 : index
    %c0_14 = arith.constant 0 : index
    %36 = vector.load %arg5[%c0_12, %c0_13, %c0_14] : memref<6x8x128xf32, #tpu.memory_space<vmem>>, vector<1x8x128xf32>
    %37 = vector.shape_cast %36 : vector<1x8x128xf32> to vector<8x128xf32>
    %38 = vector.shape_cast %35 : vector<8x128xf32> to vector<1x8x128xf32>
    tpu.vector_store %arg5[%c0_12, %c0_13, %c0_14], %38 {strides = array<i32>} : memref<6x8x128xf32, #tpu.memory_space<vmem>>, vector<1x8x128xf32>,
    %c1 = arith.constant 1 : index
    %c0_15 = arith.constant 0 : index
    %c0_16 = arith.constant 0 : index
    %39 = vector.load %arg5[%c1, %c0_15, %c0_16] : memref<6x8x128xf32, #tpu.memory_space<vmem>>, vector<1x8x128xf32>
    %40 = vector.shape_cast %39 : vector<1x8x128xf32> to vector<8x128xf32>
    %41 = arith.addf %40, %16 : vector<8x128xf32>
    %c1_17 = arith.constant 1 : index
    %c0_18 = arith.constant 0 : index
    %c0_19 = arith.constant 0 : index
    %42 = vector.load %arg5[%c1_17, %c0_18, %c0_19] : memref<6x8x128xf32, #tpu.memory_space<vmem>>, vector<1x8x128xf32>
    %43 = vector.shape_cast %42 : vector<1x8x128xf32> to vector<8x128xf32>
    %44 = vector.shape_cast %41 : vector<8x128xf32> to vector<1x8x128xf32>
    tpu.vector_store %arg5[%c1_17, %c0_18, %c0_19], %44 {strides = array<i32>} : memref<6x8x128xf32, #tpu.memory_space<vmem>>, vector<1x8x128xf32>,
    %c2 = arith.constant 2 : index
    %c0_20 = arith.constant 0 : index
    %c0_21 = arith.constant 0 : index
    %45 = vector.load %arg5[%c2, %c0_20, %c0_21] : memref<6x8x128xf32, #tpu.memory_space<vmem>>, vector<1x8x128xf32>
    %46 = vector.shape_cast %45 : vector<1x8x128xf32> to vector<8x128xf32>
    %47 = arith.addf %46, %20 : vector<8x128xf32>
    %c2_22 = arith.constant 2 : index
    %c0_23 = arith.constant 0 : index
    %c0_24 = arith.constant 0 : index
    %48 = vector.load %arg5[%c2_22, %c0_23, %c0_24] : memref<6x8x128xf32, #tpu.memory_space<vmem>>, vector<1x8x128xf32>
    %49 = vector.shape_cast %48 : vector<1x8x128xf32> to vector<8x128xf32>
    %50 = vector.shape_cast %47 : vector<8x128xf32> to vector<1x8x128xf32>
    tpu.vector_store %arg5[%c2_22, %c0_23, %c0_24], %50 {strides = array<i32>} : memref<6x8x128xf32, #tpu.memory_space<vmem>>, vector<1x8x128xf32>,
    %c3 = arith.constant 3 : index
    %c0_25 = arith.constant 0 : index
    %c0_26 = arith.constant 0 : index
    %51 = vector.load %arg5[%c3, %c0_25, %c0_26] : memref<6x8x128xf32, #tpu.memory_space<vmem>>, vector<1x8x128xf32>
    %52 = vector.shape_cast %51 : vector<1x8x128xf32> to vector<8x128xf32>
    %53 = arith.addf %52, %24 : vector<8x128xf32>
    %c3_27 = arith.constant 3 : index
    %c0_28 = arith.constant 0 : index
    %c0_29 = arith.constant 0 : index
    %54 = vector.load %arg5[%c3_27, %c0_28, %c0_29] : memref<6x8x128xf32, #tpu.memory_space<vmem>>, vector<1x8x128xf32>
    %55 = vector.shape_cast %54 : vector<1x8x128xf32> to vector<8x128xf32>
    %56 = vector.shape_cast %53 : vector<8x128xf32> to vector<1x8x128xf32>
    tpu.vector_store %arg5[%c3_27, %c0_28, %c0_29], %56 {strides = array<i32>} : memref<6x8x128xf32, #tpu.memory_space<vmem>>, vector<1x8x128xf32>,
    %c4 = arith.constant 4 : index
    %c0_30 = arith.constant 0 : index
    %c0_31 = arith.constant 0 : index
    %57 = vector.load %arg5[%c4, %c0_30, %c0_31] : memref<6x8x128xf32, #tpu.memory_space<vmem>>, vector<1x8x128xf32>
    %58 = vector.shape_cast %57 : vector<1x8x128xf32> to vector<8x128xf32>
    %59 = arith.addf %58, %28 : vector<8x128xf32>
    %c4_32 = arith.constant 4 : index
    %c0_33 = arith.constant 0 : index
    %c0_34 = arith.constant 0 : index
    %60 = vector.load %arg5[%c4_32, %c0_33, %c0_34] : memref<6x8x128xf32, #tpu.memory_space<vmem>>, vector<1x8x128xf32>
    %61 = vector.shape_cast %60 : vector<1x8x128xf32> to vector<8x128xf32>
    %62 = vector.shape_cast %59 : vector<8x128xf32> to vector<1x8x128xf32>
    tpu.vector_store %arg5[%c4_32, %c0_33, %c0_34], %62 {strides = array<i32>} : memref<6x8x128xf32, #tpu.memory_space<vmem>>, vector<1x8x128xf32>,
    %c5 = arith.constant 5 : index
    %c0_35 = arith.constant 0 : index
    %c0_36 = arith.constant 0 : index
    %63 = vector.load %arg5[%c5, %c0_35, %c0_36] : memref<6x8x128xf32, #tpu.memory_space<vmem>>, vector<1x8x128xf32>
    %64 = vector.shape_cast %63 : vector<1x8x128xf32> to vector<8x128xf32>
    %65 = arith.addf %64, %32 : vector<8x128xf32>
    %c5_37 = arith.constant 5 : index
    %c0_38 = arith.constant 0 : index
    %c0_39 = arith.constant 0 : index
    %66 = vector.load %arg5[%c5_37, %c0_38, %c0_39] : memref<6x8x128xf32, #tpu.memory_space<vmem>>, vector<1x8x128xf32>
    %67 = vector.shape_cast %66 : vector<1x8x128xf32> to vector<8x128xf32>
    %68 = vector.shape_cast %65 : vector<8x128xf32> to vector<1x8x128xf32>
    tpu.vector_store %arg5[%c5_37, %c0_38, %c0_39], %68 {strides = array<i32>} : memref<6x8x128xf32, #tpu.memory_space<vmem>>, vector<1x8x128xf32>,
    %c0_i32_40 = arith.constant 0 : i32
    %69 = arith.cmpi eq, %arg1, %c0_i32_40 : i32
    %70 = arith.extui %69 : i1 to i32
    %c0_i32_41 = arith.constant 0 : i32
    %71 = arith.cmpi ne, %70, %c0_i32_41 : i32
    scf.if %71 {
      %c0_42 = arith.constant 0 : index
      %c0_43 = arith.constant 0 : index
      %c0_44 = arith.constant 0 : index
      %72 = vector.load %arg5[%c0_42, %c0_43, %c0_44] : memref<6x8x128xf32, #tpu.memory_space<vmem>>, vector<6x8x128xf32>
      %c0_45 = arith.constant 0 : index
      %c0_46 = arith.constant 0 : index
      %c0_47 = arith.constant 0 : index
      %c0_48 = arith.constant 0 : index
      %73 = vector.load %arg4[%c0_45, %c0_46, %c0_47, %c0_48] : memref<1x6x8x128xf32, #tpu.memory_space<vmem>>, vector<1x6x8x128xf32>
      %74 = vector.shape_cast %73 : vector<1x6x8x128xf32> to vector<6x8x128xf32>
      %75 = vector.shape_cast %72 : vector<6x8x128xf32> to vector<1x6x8x128xf32>
      tpu.vector_store %arg4[%c0_45, %c0_46, %c0_47, %c0_48], %75 {strides = array<i32>} : memref<1x6x8x128xf32, #tpu.memory_space<vmem>>, vector<1x6x8x128xf32>,
    } else {
    }
    return
  }
  func.func @transform_0(%arg0: i32, %arg1: i32) -> (i32, i32) {
    %c1_i32 = arith.constant 1 : i32
    %0 = arith.muli %arg0, %c1_i32 : i32
    %1 = arith.addi %0, %arg1 : i32
    %c0_i32 = arith.constant 0 : i32
    %c0_i32_0 = arith.constant 0 : i32
    return %1, %c0_i32 : i32, i32
  }
  func.func @transform_1(%arg0: i32, %arg1: i32) -> (i32, i32) {
    %c1_i32 = arith.constant 1 : i32
    %0 = arith.muli %arg0, %c1_i32 : i32
    %1 = arith.addi %0, %arg1 : i32
    %c0_i32 = arith.constant 0 : i32
    %c0_i32_0 = arith.constant 0 : i32
    return %1, %c0_i32 : i32, i32
  }
  func.func @transform_2(%arg0: i32, %arg1: i32) -> (i32, i32, i32, i32) {
    %c0_i32 = arith.constant 0 : i32
    %c0_i32_0 = arith.constant 0 : i32
    %c0_i32_1 = arith.constant 0 : i32
    %c0_i32_2 = arith.constant 0 : i32
    return %arg0, %c0_i32, %c0_i32_0, %c0_i32_1 : i32, i32, i32, i32
  }
}

</mosaic_0001>

<bundles_post_ra>
// kernel: tpu_custom_call.1
= control target key start
LH: loop header
LB: loop body
LE: loop exit
PB: predicated region body
PF: predicated region fallthrough
CT: control target
= control target key end

     0   :  { %7 = vsyncpa [#allocation4], 0  ;;  %s286_s0 = inlined_call_operand.hbm [shape: f32[16,128], index: 0, kind: input, shape index: {}]   ;;  %s287_s1 = inlined_call_operand.hbm [shape: f32[16,128], index: 1, kind: input, shape index: {}]   ;;  %s288_s2 = inlined_call_operand.hbm [shape: f32[1,6,8,128], index: 2, kind: output, shape index: {}]  }
   0x1   :  { %8 = vsyncpa [#allocation7], 0 }
   0x2   :  { %9 = vsyncpa [#allocation5], 0  ;;  %s221_s9 = smov [#allocation3]   ;;  %s149_s13 = scalar_lea.hbm %s286_s0, 256 }
   0x3   :  { %s19_s10 = sshll.u32 %s221_s9, 4  ;;  %p150_p0 = scmp.ne.s32.totalorder %s286_s0, %s149_s13  ;;  %s20_s10 = int_to_ptr.vmem [resolvable:$true] %s19_s10 }
   0x4   :  { %p153_p1 = scmp.lt.u32.totalorder %s149_s13, %s286_s0 }
   0x6   :  { %p155_p2 = pnand %p153_p1, %p150_p0 }
   0x8   :  { %158 = shalt.err (!%p155_p2)
}
   0x9   :  { %s159_s18 = scalar_lea.vmem %s20_s10, 256  ;;  %p164_p4 = scmp.lt.s32.totalorder %s20_s10, %s20_s10 }
   0xa   :  { %p160_p3 = scmp.ne.s32.totalorder %s20_s10, %s159_s18  ;;  %p165_p5 = scmp.lt.s32.totalorder %s159_s18, %s159_s18 }
   0xc   :  { %p166_p6 = por %p165_p5, %p164_p4 }
   0xe   :  { %p167_p7 = pnand %p166_p6, %p160_p3 }
  0x10   :  { %170 = shalt.err (!%p167_p7)
}
  0x11   :  { %s222_s19 = smov 128   ;;  %s223_s20 = smov 8  }
  0x12   :  { %25 = dma.hbm_to_vmem [thread:$0]  %s286_s0, 256, %s20_s10, [#allocation4], %s222_s19, %s222_s19, %s223_s20  }
  0x13   :  { %s224_s23 = smov [#allocation6]   ;;  %s171_s27 = scalar_lea.hbm %s287_s1, 256 }
  0x14   :  { %s35_s24 = sshll.u32 %s224_s23, 4  ;;  %p172_p8 = scmp.ne.s32.totalorder %s287_s1, %s171_s27  ;;  %s36_s24 = int_to_ptr.vmem [resolvable:$true] %s35_s24 }
  0x15   :  { %p175_p9 = scmp.lt.u32.totalorder %s171_s27, %s287_s1 }
  0x17   :  { %p177_p10 = pnand %p175_p9, %p172_p8 }
  0x19   :  { %180 = shalt.err (!%p177_p10)
}
  0x1a   :  { %s181_s4 = scalar_lea.vmem %s36_s24, 256  ;;  %p186_p12 = scmp.lt.s32.totalorder %s36_s24, %s36_s24 }
  0x1b   :  { %p182_p11 = scmp.ne.s32.totalorder %s36_s24, %s181_s4  ;;  %p187_p13 = scmp.lt.s32.totalorder %s181_s4, %s181_s4 }
  0x1d   :  { %p188_p0 = por %p187_p13, %p186_p12 }
  0x1f   :  { %p189_p1 = pnand %p188_p0, %p182_p11 }
  0x21   :  { %192 = shalt.err (!%p189_p1)
}
  0x22   :  { %41 = dma.hbm_to_vmem [thread:$0]  %s287_s1, 256, %s36_s24, [#allocation7], %s222_s19, %s222_s19, %s223_s20  }
  0x23   :  { %215 = dma.done.wait [#allocation4], 256  }
  0x24   :  { %216 = vsyncadd [#allocation4], 4294967040 }
  0x25   :  { %217 = dma.done.wait [#allocation7], 256  }
  0x26   :  { %218 = vsyncadd [#allocation7], 4294967040  ;;  %v62_v0 = vld [vmem:[#allocation3] sm:$0xff]  ;;  %v63_v1 = vld [vmem:[#allocation3 + $0x8] sm:$0xff]  ;;  %s225_s1 = smov [#allocation8]  }
  0x27   :  { %v64_v2 = vld [vmem:[#allocation6] sm:$0xff]  ;;  %v68_v3 = vadd.f32 %v63_v1, %v62_v0  ;;  %v65_v4 = vld [vmem:[#allocation6 + $0x8] sm:$0xff]  ;;  %v76_v6 = vmul.f32 %v62_v0, %v62_v0  ;;  %v77_v7 = vmul.f32 %v63_v1, %v63_v1  ;;  %s131_s6 = sshll.u32 %s225_s1, 4  ;;  %s132_s6 = int_to_ptr.vmem [resolvable:$true] %s131_s6 }
  0x28   :  { %v72_v5 = vmul.f32 %v64_v2, %v62_v0  ;;  %v70_v8 = vadd.f32 %v65_v4, %v64_v2  ;;  %v73_v9 = vmul.f32 %v65_v4, %v63_v1  ;;  %v80_v10 = vmul.f32 %v64_v2, %v64_v2  ;;  %s193_s7 = scalar_lea.vmem %s132_s6, 768  ;;  %p198_p3 = scmp.lt.s32.totalorder %s132_s6, %s132_s6 }
  0x29   :  { %v81_v11 = vmul.f32 %v65_v4, %v65_v4  ;;  %120 = vst [vmem:[#allocation8] sm:$0xff] %v68_v3  ;;  %v78_v12 = vadd.f32 %v77_v7, %v76_v6  ;;  %v66_v13 = vsub.f32 %v62_v0, %v64_v2  ;;  %v67_v14 = vsub.f32 %v63_v1, %v65_v4  ;;  %p194_p2 = scmp.ne.s32.totalorder %s132_s6, %s193_s7  ;;  %p199_p4 = scmp.lt.s32.totalorder %s193_s7, %s193_s7 }
  0x2a   :  { %121 = vst [vmem:[#allocation8 + $0x8] sm:$0xff] %v70_v8  ;;  %v74_v15 = vadd.f32 %v73_v9, %v72_v5 }
  0x2b   :  { %v82_v16 = vadd.f32 %v81_v11, %v80_v10  ;;  %123 = vst [vmem:[#allocation8 + $0x18] sm:$0xff] %v78_v12  ;;  %v84_v17 = vmul.f32 %v66_v13, %v66_v13  ;;  %v85_v18 = vmul.f32 %v67_v14, %v67_v14  ;;  %p200_p5 = por %p199_p4, %p198_p3 }
  0x2c   :  { %122 = vst [vmem:[#allocation8 + $0x10] sm:$0xff] %v74_v15 }
  0x2d   :  { %124 = vst [vmem:[#allocation8 + $0x20] sm:$0xff] %v82_v16  ;;  %v86_v19 = vadd.f32 %v85_v18, %v84_v17  ;;  %p201_p6 = pnand %p200_p5, %p194_p2 }
  0x2f   :  { %125 = vst [vmem:[#allocation8 + $0x28] sm:$0xff] %v86_v19 }
  0x30   :  { %204 = shalt.err (!%p201_p6)
}
  0x31   :  { %s205_s10 = scalar_lea.hbm %s288_s2, 768 }
  0x32   :  { %p206_p7 = scmp.ne.s32.totalorder %s288_s2, %s205_s10  ;;  %p209_p8 = scmp.lt.u32.totalorder %s205_s10, %s288_s2 }
  0x34   :  { %p211_p9 = pnand %p209_p8, %p206_p7 }
  0x36   :  { %214 = shalt.err (!%p211_p9)
}
  0x37   :  { %137 = dma.vmem_to_hbm [thread:$0]  %s132_s6, 768, %s288_s2, [#allocation5], %s222_s19, %s222_s19, %s223_s20  }
  0x38   :  { %219 = dma.done.wait [#allocation5], 768  }
  0x39   :  { %220 = vsyncadd [#allocation5], 4294966528 }
  0x3a   :  { %141 = vsyncpa [#allocation4], 1 }
  0x3b   :  { %142 = vsyncpa [#allocation7], 1 }
  0x3c   :  { %143 = vsyncpa [#allocation5], 1 }

</bundles_post_ra>
